<compile_context>
chip_gen: v5e
topology: v5e:2x2
jax: 0.10.0
libtpu: 0.0.40
codegen_flags: <defaults>
</compile_context>

<pallas_src>
import functools

import jax
import jax.numpy as jnp
from jax.experimental import pallas as pl
from jax.experimental.pallas import tpu as pltpu


def _round_up(x, m):
    return ((x + m - 1) // m) * m


def _rnd_kernel(n_layers, obs_ref, *refs):
    """refs = (wp_l, bp_l, wt_l, bt_l) * n_layers, pred_ref, targ_ref.

    Runs predictor and target MLPs on the same obs tile. Matmul operands may be
    bf16; accumulation, bias add and ReLU are f32.
    """
    params = refs[:4 * n_layers]
    pred_ref = refs[4 * n_layers]
    targ_ref = refs[4 * n_layers + 1]

    x = obs_ref[...]          # f32 [tile_b, obs_dim]
    hp = x
    ht = x
    for l in range(n_layers):
        wp = params[4 * l][...]
        bp = params[4 * l + 1][...]
        wt = params[4 * l + 2][...]
        bt = params[4 * l + 3][...]
        hp = jnp.maximum(
            jnp.dot(hp.astype(wp.dtype), wp, preferred_element_type=jnp.float32) + bp,
            0.0)
        ht = jnp.maximum(
            jnp.dot(ht.astype(wt.dtype), wt, preferred_element_type=jnp.float32) + bt,
            0.0)
    pred_ref[...] = hp.astype(pred_ref.dtype)
    targ_ref[...] = ht.astype(targ_ref.dtype)


def prepare_rnd_params(predictor_params, target_params, *, matmul_dtype=jnp.bfloat16):
    """One-time (init-time) padding + cast of the RndNetwork weights.

    predictor_params / target_params: list of (W[in, out], b[1, out]) per layer.
    All layer output widths are padded to multiples of 128 lanes; layer-0 K keeps
    the true obs_dim. Padded rows/cols are zero so results are exact.
    """
    n_layers = len(predictor_params)
    dims = [predictor_params[0][0].shape[0]] + [
        predictor_params[l][0].shape[1] for l in range(n_layers)]
    obs_dim = dims[0]
    k_pad = [obs_dim] + [_round_up(d, 128) for d in dims[1:-1]]
    n_pad = [_round_up(d, 128) for d in dims[1:]]

    def pad_net(params):
        out = []
        for l, (w, b) in enumerate(params):
            kin, nout = k_pad[l], n_pad[l]
            wz = jnp.zeros((kin, nout), jnp.float32)
            wz = wz.at[:w.shape[0], :w.shape[1]].set(w.astype(jnp.float32))
            bz = jnp.zeros((1, nout), jnp.float32)
            bz = bz.at[:, :w.shape[1]].set(b.reshape(1, -1).astype(jnp.float32))
            out.append((wz.astype(matmul_dtype), bz))
        return out

    return {
        "n_layers": n_layers,
        "dims": dims,
        "out_pad": n_pad[-1],
        "max_width": max(n_pad),
        "predictor": pad_net(predictor_params),
        "target": pad_net(target_params),
    }


def rnd_network_forward(obs, prepared, *, tile_b=512):
    """RndNetwork.forward.  obs: [B, obs_dim] -> (predict_feature, target_feature)."""
    n_layers = prepared["n_layers"]
    dims = prepared["dims"]
    obs_dim = dims[0]
    out_dim = dims[-1]
    out_p = prepared["out_pad"]
    max_w = max(prepared["max_width"], 128)
    B = obs.shape[0]
    assert obs.shape[1] == obs_dim

    # --- Batch tiling --------------------------------------------------------
    b_pad8 = _round_up(max(B, 1), 8)
    tile = max(8, min(_round_up(tile_b, 8), b_pad8))
    if b_pad8 >= 512:
        # Keep >= 2 grid steps (v7x has 2 TensorCores; "parallel" axis shards them)
        # with the tile a multiple of 256 (v6e/v7x 256-wide MXU).
        tile = min(tile, _round_up((b_pad8 + 1) // 2, 256))
    tile = _round_up(tile, 8)
    b_pad = _round_up(B, tile)
    grid_b = b_pad // tile

    obs_f = obs.astype(jnp.float32)
    if b_pad != B:  # pad only the batch dim; last dim stays the true obs_dim
        obs_f = jnp.concatenate(
            [obs_f, jnp.zeros((b_pad - B, obs_dim), jnp.float32)], axis=0)

    # --- VMEM budget (generation-aware) --------------------------------------
    all_params = prepared["predictor"] + prepared["target"]
    weight_bytes = sum(int(w.size) * w.dtype.itemsize + int(b.size) * b.dtype.itemsize
                       for (w, b) in all_params)
    io_bytes = 2 * tile * obs_dim * 4 + 2 * 2 * tile * out_p * 4   # dbl-buffered in/out
    act_bytes = 8 * tile * max_w * 4                               # live f32 intermediates
    vmem_bytes = int(io_bytes + 2 * weight_bytes + act_bytes)
    try:
        cap = int(getattr(pltpu.get_tpu_info(), "vmem_capacity_bytes", 64 << 20))
        if cap <= 0:
            cap = 64 << 20
    except Exception:
        cap = 64 << 20  # v7x-safe fallback
    vmem_bytes = int(min(max(vmem_bytes, 32 << 20), int(0.75 * cap)))

    flops = sum(2 * b_pad * w.shape[0] * w.shape[1] for (w, _) in all_params)
    bytes_accessed = int(obs_f.size * 4 + weight_bytes + 2 * b_pad * out_p * 4)
    cost = pl.CostEstimate(flops=int(flops), transcendentals=0,
                           bytes_accessed=bytes_accessed)

    kernel = functools.partial(_rnd_kernel, n_layers)

    def _run(weight_mode):
        flat = [obs_f]
        in_specs = [pl.BlockSpec((tile, obs_dim), lambda i: (i, 0))]
        spec_kwargs = {} if weight_mode is None else {"pipeline_mode": weight_mode}
        for l in range(n_layers):
            wp, bp = prepared["predictor"][l]
            wt, bt = prepared["target"][l]
            for arr in (wp, bp, wt, bt):
                flat.append(arr)
                # Constant block index -> weights stay VMEM-resident across steps.
                in_specs.append(pl.BlockSpec(arr.shape, lambda i: (0, 0), **spec_kwargs))
        return pl.pallas_call(
            kernel,
            out_shape=(jax.ShapeDtypeStruct((b_pad, out_p), jnp.float32),
                       jax.ShapeDtypeStruct((b_pad, out_p), jnp.float32)),
            grid=(grid_b,),
            in_specs=in_specs,
            out_specs=(pl.BlockSpec((tile, out_p), lambda i: (i, 0)),
                       pl.BlockSpec((tile, out_p), lambda i: (i, 0))),
            compiler_params=pltpu.CompilerParams(
                dimension_semantics=("parallel",),
                vmem_limit_bytes=vmem_bytes,
            ),
            cost_estimate=cost,
        )(*flat)

    try:
        # Single-buffer the constant-index weight/bias blocks (halves resident VMEM).
        pred_p, targ_p = _run(pl.Buffered(1))
    except Exception:
        pred_p, targ_p = _run(None)

    if b_pad != B or out_p != out_dim:
        predict_feature = pred_p[:B, :out_dim]
        target_feature = targ_p[:B, :out_dim]
    else:
        predict_feature, target_feature = pred_p, targ_p
    return predict_feature, target_feature


def _init_linear(key, fan_in, fan_out):
    """Deterministic init mimicking torch.nn.Linear defaults (uniform +-1/sqrt(fan_in))."""
    kw, kb = jax.random.split(key)
    bound = 1.0 / jnp.sqrt(jnp.float32(fan_in))
    w = jax.random.uniform(kw, (fan_in, fan_out), jnp.float32, -bound, bound)
    b = jax.random.uniform(kb, (1, fan_out), jnp.float32, -bound, bound)
    return w, b


def make_rnd_params(key, obs_dim, hidden_size_list):
    dims = [obs_dim] + list(hidden_size_list)
    n_layers = len(hidden_size_list)
    keys = jax.random.split(key, 2 * n_layers)
    predictor, target = [], []
    for li in range(n_layers):
        predictor.append(_init_linear(keys[li], dims[li], dims[li + 1]))
        target.append(_init_linear(keys[n_layers + li], dims[li], dims[li + 1]))
    return predictor, target


if __name__ == "__main__":
    key = jax.random.PRNGKey(0)
    k_obs, k_params = jax.random.split(key)

    batch = 8
    obs_dim = 16
    hidden_size_list = [32, 64]

    obs = jax.random.normal(k_obs, (batch, obs_dim), jnp.float32)
    predictor_params, target_params = make_rnd_params(k_params, obs_dim, hidden_size_list)

    # Pure-JAX reference (FCEncoder: ReLU after every Linear).
    def ref_mlp(x, params):
        h = x
        for w, b in params:
            h = jnp.maximum(h @ w + b.reshape(1, -1), 0.0)
        return h

    ref_pred = ref_mlp(obs, predictor_params)
    ref_targ = ref_mlp(obs, target_params)

    # Exact path: f32 matmul operands.
    prep_f32 = prepare_rnd_params(predictor_params, target_params,
                                  matmul_dtype=jnp.float32)
    pred_f32, targ_f32 = rnd_network_forward(obs, prep_f32)
    jax.block_until_ready((pred_f32, targ_f32))
    assert pred_f32.shape == (batch, hidden_size_list[-1])
    assert targ_f32.shape == (batch, hidden_size_list[-1])
    assert jnp.allclose(pred_f32, ref_pred, atol=1e-5, rtol=1e-5)
    assert jnp.allclose(targ_f32, ref_targ, atol=1e-5, rtol=1e-5)

    # Fast (default) path: bf16 matmul operands, f32 accumulate / bias / ReLU.
    prep_bf16 = prepare_rnd_params(predictor_params, target_params)
    pred_bf, targ_bf = rnd_network_forward(obs, prep_bf16)
    jax.block_until_ready((pred_bf, targ_bf))
    assert jnp.allclose(pred_bf, ref_pred, atol=1e-1, rtol=1e-1)
    assert jnp.allclose(targ_bf, ref_targ, atol=1e-1, rtol=1e-1)

    print("KERNEL_OK")
</pallas_src>

<mosaic_0001>
module attributes {stable_mosaic.version = 11 : i64} {
  func.func @_rnd_kernel(%arg0: i32, %arg1: memref<8x16xf32, #tpu.memory_space<vmem>>, %arg2: memref<16x128xf32, #tpu.memory_space<vmem>>, %arg3: memref<1x128xf32, #tpu.memory_space<vmem>>, %arg4: memref<16x128xf32, #tpu.memory_space<vmem>>, %arg5: memref<1x128xf32, #tpu.memory_space<vmem>>, %arg6: memref<128x128xf32, #tpu.memory_space<vmem>>, %arg7: memref<1x128xf32, #tpu.memory_space<vmem>>, %arg8: memref<128x128xf32, #tpu.memory_space<vmem>>, %arg9: memref<1x128xf32, #tpu.memory_space<vmem>>, %arg10: memref<8x128xf32, #tpu.memory_space<vmem>>, %arg11: memref<8x128xf32, #tpu.memory_space<vmem>>) attributes {dimension_semantics = [#tpu.dimension_semantics<parallel>], iteration_bounds = array<i64: 1>, scalar_prefetch = 0 : i64, scratch_operands = 0 : i64, tpu.core_type = #tpu.core_type<tc>, window_params = [{transform_indices = @transform_0, window_bounds = array<i64: 8, 16>}, {pipeline_mode = #tpu.pipeline_mode<synchronous>, transform_indices = @transform_1, window_bounds = array<i64: 16, 128>}, {pipeline_mode = #tpu.pipeline_mode<synchronous>, transform_indices = @transform_2, window_bounds = array<i64: 1, 128>}, {pipeline_mode = #tpu.pipeline_mode<synchronous>, transform_indices = @transform_3, window_bounds = array<i64: 16, 128>}, {pipeline_mode = #tpu.pipeline_mode<synchronous>, transform_indices = @transform_4, window_bounds = array<i64: 1, 128>}, {pipeline_mode = #tpu.pipeline_mode<synchronous>, transform_indices = @transform_5, window_bounds = array<i64: 128, 128>}, {pipeline_mode = #tpu.pipeline_mode<synchronous>, transform_indices = @transform_6, window_bounds = array<i64: 1, 128>}, {pipeline_mode = #tpu.pipeline_mode<synchronous>, transform_indices = @transform_7, window_bounds = array<i64: 128, 128>}, {pipeline_mode = #tpu.pipeline_mode<synchronous>, transform_indices = @transform_8, window_bounds = array<i64: 1, 128>}, {transform_indices = @transform_9, window_bounds = array<i64: 8, 128>}, {transform_indices = @transform_10, window_bounds = array<i64: 8, 128>}]} {
    %c0 = arith.constant 0 : index
    %c0_0 = arith.constant 0 : index
    %0 = vector.load %arg1[%c0, %c0_0] : memref<8x16xf32, #tpu.memory_space<vmem>>, vector<8x16xf32>
    %c0_1 = arith.constant 0 : index
    %c0_2 = arith.constant 0 : index
    %1 = vector.load %arg2[%c0_1, %c0_2] : memref<16x128xf32, #tpu.memory_space<vmem>>, vector<16x128xf32>
    %c0_3 = arith.constant 0 : index
    %c0_4 = arith.constant 0 : index
    %2 = vector.load %arg3[%c0_3, %c0_4] : memref<1x128xf32, #tpu.memory_space<vmem>>, vector<1x128xf32>
    %c0_5 = arith.constant 0 : index
    %c0_6 = arith.constant 0 : index
    %3 = vector.load %arg4[%c0_5, %c0_6] : memref<16x128xf32, #tpu.memory_space<vmem>>, vector<16x128xf32>
    %c0_7 = arith.constant 0 : index
    %c0_8 = arith.constant 0 : index
    %4 = vector.load %arg5[%c0_7, %c0_8] : memref<1x128xf32, #tpu.memory_space<vmem>>, vector<1x128xf32>
    %cst = arith.constant dense<0.000000e+00> : vector<8x128xf32>
    %5 = tpu.matmul %0, %1, %cst {dimension_numbers = #tpu.dot_dimension_numbers<[1], [0], [0], [1], [0, 0, 1, 1], [], []>} : vector<8x16xf32>, vector<16x128xf32>, vector<8x128xf32> -> vector<8x128xf32>
    %6 = vector.broadcast %2 : vector<1x128xf32> to vector<8x128xf32>
    %7 = arith.addf %5, %6 : vector<8x128xf32>
    %cst_9 = arith.constant 0.000000e+00 : f32
    %8 = vector.broadcast %cst_9 : f32 to vector<8x128xf32>
    %9 = arith.maximumf %7, %8 : vector<8x128xf32>
    %cst_10 = arith.constant dense<0.000000e+00> : vector<8x128xf32>
    %10 = tpu.matmul %0, %3, %cst_10 {dimension_numbers = #tpu.dot_dimension_numbers<[1], [0], [0], [1], [0, 0, 1, 1], [], []>} : vector<8x16xf32>, vector<16x128xf32>, vector<8x128xf32> -> vector<8x128xf32>
    %11 = vector.broadcast %4 : vector<1x128xf32> to vector<8x128xf32>
    %12 = arith.addf %10, %11 : vector<8x128xf32>
    %cst_11 = arith.constant 0.000000e+00 : f32
    %13 = vector.broadcast %cst_11 : f32 to vector<8x128xf32>
    %14 = arith.maximumf %12, %13 : vector<8x128xf32>
    %c0_12 = arith.constant 0 : index
    %c0_13 = arith.constant 0 : index
    %15 = vector.load %arg6[%c0_12, %c0_13] : memref<128x128xf32, #tpu.memory_space<vmem>>, vector<128x128xf32>
    %c0_14 = arith.constant 0 : index
    %c0_15 = arith.constant 0 : index
    %16 = vector.load %arg7[%c0_14, %c0_15] : memref<1x128xf32, #tpu.memory_space<vmem>>, vector<1x128xf32>
    %c0_16 = arith.constant 0 : index
    %c0_17 = arith.constant 0 : index
    %17 = vector.load %arg8[%c0_16, %c0_17] : memref<128x128xf32, #tpu.memory_space<vmem>>, vector<128x128xf32>
    %c0_18 = arith.constant 0 : index
    %c0_19 = arith.constant 0 : index
    %18 = vector.load %arg9[%c0_18, %c0_19] : memref<1x128xf32, #tpu.memory_space<vmem>>, vector<1x128xf32>
    %cst_20 = arith.constant dense<0.000000e+00> : vector<8x128xf32>
    %19 = tpu.matmul %9, %15, %cst_20 {dimension_numbers = #tpu.dot_dimension_numbers<[1], [0], [0], [1], [0, 0, 1, 1], [], []>} : vector<8x128xf32>, vector<128x128xf32>, vector<8x128xf32> -> vector<8x128xf32>
    %20 = vector.broadcast %16 : vector<1x128xf32> to vector<8x128xf32>
    %21 = arith.addf %19, %20 : vector<8x128xf32>
    %cst_21 = arith.constant 0.000000e+00 : f32
    %22 = vector.broadcast %cst_21 : f32 to vector<8x128xf32>
    %23 = arith.maximumf %21, %22 : vector<8x128xf32>
    %cst_22 = arith.constant dense<0.000000e+00> : vector<8x128xf32>
    %24 = tpu.matmul %14, %17, %cst_22 {dimension_numbers = #tpu.dot_dimension_numbers<[1], [0], [0], [1], [0, 0, 1, 1], [], []>} : vector<8x128xf32>, vector<128x128xf32>, vector<8x128xf32> -> vector<8x128xf32>
    %25 = vector.broadcast %18 : vector<1x128xf32> to vector<8x128xf32>
    %26 = arith.addf %24, %25 : vector<8x128xf32>
    %cst_23 = arith.constant 0.000000e+00 : f32
    %27 = vector.broadcast %cst_23 : f32 to vector<8x128xf32>
    %28 = arith.maximumf %26, %27 : vector<8x128xf32>
    %c0_24 = arith.constant 0 : index
    %c0_25 = arith.constant 0 : index
    %29 = vector.load %arg10[%c0_24, %c0_25] : memref<8x128xf32, #tpu.memory_space<vmem>>, vector<8x128xf32>
    tpu.vector_store %arg10[%c0_24, %c0_25], %23 {strides = array<i32>} : memref<8x128xf32, #tpu.memory_space<vmem>>, vector<8x128xf32>,
    %c0_26 = arith.constant 0 : index
    %c0_27 = arith.constant 0 : index
    %30 = vector.load %arg11[%c0_26, %c0_27] : memref<8x128xf32, #tpu.memory_space<vmem>>, vector<8x128xf32>
    tpu.vector_store %arg11[%c0_26, %c0_27], %28 {strides = array<i32>} : memref<8x128xf32, #tpu.memory_space<vmem>>, vector<8x128xf32>,
    return
  }
  func.func @transform_0(%arg0: i32) -> (i32, i32) {
    %c0_i32 = arith.constant 0 : i32
    %c0_i32_0 = arith.constant 0 : i32
    return %arg0, %c0_i32 : i32, i32
  }
  func.func @transform_1(%arg0: i32) -> (i32, i32) {
    %c0_i32 = arith.constant 0 : i32
    %c0_i32_0 = arith.constant 0 : i32
    %c0_i32_1 = arith.constant 0 : i32
    return %c0_i32, %c0_i32_0 : i32, i32
  }
  func.func @transform_2(%arg0: i32) -> (i32, i32) {
    %c0_i32 = arith.constant 0 : i32
    %c0_i32_0 = arith.constant 0 : i32
    %c0_i32_1 = arith.constant 0 : i32
    return %c0_i32, %c0_i32_0 : i32, i32
  }
  func.func @transform_3(%arg0: i32) -> (i32, i32) {
    %c0_i32 = arith.constant 0 : i32
    %c0_i32_0 = arith.constant 0 : i32
    %c0_i32_1 = arith.constant 0 : i32
    return %c0_i32, %c0_i32_0 : i32, i32
  }
  func.func @transform_4(%arg0: i32) -> (i32, i32) {
    %c0_i32 = arith.constant 0 : i32
    %c0_i32_0 = arith.constant 0 : i32
    %c0_i32_1 = arith.constant 0 : i32
    return %c0_i32, %c0_i32_0 : i32, i32
  }
  func.func @transform_5(%arg0: i32) -> (i32, i32) {
    %c0_i32 = arith.constant 0 : i32
    %c0_i32_0 = arith.constant 0 : i32
    %c0_i32_1 = arith.constant 0 : i32
    return %c0_i32, %c0_i32_0 : i32, i32
  }
  func.func @transform_6(%arg0: i32) -> (i32, i32) {
    %c0_i32 = arith.constant 0 : i32
    %c0_i32_0 = arith.constant 0 : i32
    %c0_i32_1 = arith.constant 0 : i32
    return %c0_i32, %c0_i32_0 : i32, i32
  }
  func.func @transform_7(%arg0: i32) -> (i32, i32) {
    %c0_i32 = arith.constant 0 : i32
    %c0_i32_0 = arith.constant 0 : i32
    %c0_i32_1 = arith.constant 0 : i32
    return %c0_i32, %c0_i32_0 : i32, i32
  }
  func.func @transform_8(%arg0: i32) -> (i32, i32) {
    %c0_i32 = arith.constant 0 : i32
    %c0_i32_0 = arith.constant 0 : i32
    %c0_i32_1 = arith.constant 0 : i32
    return %c0_i32, %c0_i32_0 : i32, i32
  }
  func.func @transform_9(%arg0: i32) -> (i32, i32) {
    %c0_i32 = arith.constant 0 : i32
    %c0_i32_0 = arith.constant 0 : i32
    return %arg0, %c0_i32 : i32, i32
  }
  func.func @transform_10(%arg0: i32) -> (i32, i32) {
    %c0_i32 = arith.constant 0 : i32
    %c0_i32_0 = arith.constant 0 : i32
    return %arg0, %c0_i32 : i32, i32
  }
}

module attributes {stable_mosaic.version = 11 : i64} {
  func.func @_rnd_kernel(%arg0: i32, %arg1: memref<8x16xf32, #tpu.memory_space<vmem>>, %arg2: memref<16x128xf32, #tpu.memory_space<vmem>>, %arg3: memref<1x128xf32, #tpu.memory_space<vmem>>, %arg4: memref<16x128xf32, #tpu.memory_space<vmem>>, %arg5: memref<1x128xf32, #tpu.memory_space<vmem>>, %arg6: memref<128x128xf32, #tpu.memory_space<vmem>>, %arg7: memref<1x128xf32, #tpu.memory_space<vmem>>, %arg8: memref<128x128xf32, #tpu.memory_space<vmem>>, %arg9: memref<1x128xf32, #tpu.memory_space<vmem>>, %arg10: memref<8x128xf32, #tpu.memory_space<vmem>>, %arg11: memref<8x128xf32, #tpu.memory_space<vmem>>) attributes {dimension_semantics = [#tpu.dimension_semantics<parallel>], iteration_bounds = array<i64: 1>, scalar_prefetch = 0 : i64, scratch_operands = 0 : i64, tpu.core_type = #tpu.core_type<tc>, window_params = [{transform_indices = @transform_0, window_bounds = array<i64: 8, 16>}, {pipeline_mode = #tpu.pipeline_mode<synchronous>, transform_indices = @transform_1, window_bounds = array<i64: 16, 128>}, {pipeline_mode = #tpu.pipeline_mode<synchronous>, transform_indices = @transform_2, window_bounds = array<i64: 1, 128>}, {pipeline_mode = #tpu.pipeline_mode<synchronous>, transform_indices = @transform_3, window_bounds = array<i64: 16, 128>}, {pipeline_mode = #tpu.pipeline_mode<synchronous>, transform_indices = @transform_4, window_bounds = array<i64: 1, 128>}, {pipeline_mode = #tpu.pipeline_mode<synchronous>, transform_indices = @transform_5, window_bounds = array<i64: 128, 128>}, {pipeline_mode = #tpu.pipeline_mode<synchronous>, transform_indices = @transform_6, window_bounds = array<i64: 1, 128>}, {pipeline_mode = #tpu.pipeline_mode<synchronous>, transform_indices = @transform_7, window_bounds = array<i64: 128, 128>}, {pipeline_mode = #tpu.pipeline_mode<synchronous>, transform_indices = @transform_8, window_bounds = array<i64: 1, 128>}, {transform_indices = @transform_9, window_bounds = array<i64: 8, 128>}, {transform_indices = @transform_10, window_bounds = array<i64: 8, 128>}]} {
    %c0 = arith.constant 0 : index
    %c0_0 = arith.constant 0 : index
    %0 = vector.load %arg1[%c0, %c0_0] : memref<8x16xf32, #tpu.memory_space<vmem>>, vector<8x16xf32>
    %c0_1 = arith.constant 0 : index
    %c0_2 = arith.constant 0 : index
    %1 = vector.load %arg2[%c0_1, %c0_2] : memref<16x128xf32, #tpu.memory_space<vmem>>, vector<16x128xf32>
    %c0_3 = arith.constant 0 : index
    %c0_4 = arith.constant 0 : index
    %2 = vector.load %arg3[%c0_3, %c0_4] : memref<1x128xf32, #tpu.memory_space<vmem>>, vector<1x128xf32>
    %c0_5 = arith.constant 0 : index
    %c0_6 = arith.constant 0 : index
    %3 = vector.load %arg4[%c0_5, %c0_6] : memref<16x128xf32, #tpu.memory_space<vmem>>, vector<16x128xf32>
    %c0_7 = arith.constant 0 : index
    %c0_8 = arith.constant 0 : index
    %4 = vector.load %arg5[%c0_7, %c0_8] : memref<1x128xf32, #tpu.memory_space<vmem>>, vector<1x128xf32>
    %cst = arith.constant dense<0.000000e+00> : vector<8x128xf32>
    %5 = tpu.matmul %0, %1, %cst {dimension_numbers = #tpu.dot_dimension_numbers<[1], [0], [0], [1], [0, 0, 1, 1], [], []>} : vector<8x16xf32>, vector<16x128xf32>, vector<8x128xf32> -> vector<8x128xf32>
    %6 = vector.broadcast %2 : vector<1x128xf32> to vector<8x128xf32>
    %7 = arith.addf %5, %6 : vector<8x128xf32>
    %cst_9 = arith.constant 0.000000e+00 : f32
    %8 = vector.broadcast %cst_9 : f32 to vector<8x128xf32>
    %9 = arith.maximumf %7, %8 : vector<8x128xf32>
    %cst_10 = arith.constant dense<0.000000e+00> : vector<8x128xf32>
    %10 = tpu.matmul %0, %3, %cst_10 {dimension_numbers = #tpu.dot_dimension_numbers<[1], [0], [0], [1], [0, 0, 1, 1], [], []>} : vector<8x16xf32>, vector<16x128xf32>, vector<8x128xf32> -> vector<8x128xf32>
    %11 = vector.broadcast %4 : vector<1x128xf32> to vector<8x128xf32>
    %12 = arith.addf %10, %11 : vector<8x128xf32>
    %cst_11 = arith.constant 0.000000e+00 : f32
    %13 = vector.broadcast %cst_11 : f32 to vector<8x128xf32>
    %14 = arith.maximumf %12, %13 : vector<8x128xf32>
    %c0_12 = arith.constant 0 : index
    %c0_13 = arith.constant 0 : index
    %15 = vector.load %arg6[%c0_12, %c0_13] : memref<128x128xf32, #tpu.memory_space<vmem>>, vector<128x128xf32>
    %c0_14 = arith.constant 0 : index
    %c0_15 = arith.constant 0 : index
    %16 = vector.load %arg7[%c0_14, %c0_15] : memref<1x128xf32, #tpu.memory_space<vmem>>, vector<1x128xf32>
    %c0_16 = arith.constant 0 : index
    %c0_17 = arith.constant 0 : index
    %17 = vector.load %arg8[%c0_16, %c0_17] : memref<128x128xf32, #tpu.memory_space<vmem>>, vector<128x128xf32>
    %c0_18 = arith.constant 0 : index
    %c0_19 = arith.constant 0 : index
    %18 = vector.load %arg9[%c0_18, %c0_19] : memref<1x128xf32, #tpu.memory_space<vmem>>, vector<1x128xf32>
    %cst_20 = arith.constant dense<0.000000e+00> : vector<8x128xf32>
    %19 = tpu.matmul %9, %15, %cst_20 {dimension_numbers = #tpu.dot_dimension_numbers<[1], [0], [0], [1], [0, 0, 1, 1], [], []>} : vector<8x128xf32>, vector<128x128xf32>, vector<8x128xf32> -> vector<8x128xf32>
    %20 = vector.broadcast %16 : vector<1x128xf32> to vector<8x128xf32>
    %21 = arith.addf %19, %20 : vector<8x128xf32>
    %cst_21 = arith.constant 0.000000e+00 : f32
    %22 = vector.broadcast %cst_21 : f32 to vector<8x128xf32>
    %23 = arith.maximumf %21, %22 : vector<8x128xf32>
    %cst_22 = arith.constant dense<0.000000e+00> : vector<8x128xf32>
    %24 = tpu.matmul %14, %17, %cst_22 {dimension_numbers = #tpu.dot_dimension_numbers<[1], [0], [0], [1], [0, 0, 1, 1], [], []>} : vector<8x128xf32>, vector<128x128xf32>, vector<8x128xf32> -> vector<8x128xf32>
    %25 = vector.broadcast %18 : vector<1x128xf32> to vector<8x128xf32>
    %26 = arith.addf %24, %25 : vector<8x128xf32>
    %cst_23 = arith.constant 0.000000e+00 : f32
    %27 = vector.broadcast %cst_23 : f32 to vector<8x128xf32>
    %28 = arith.maximumf %26, %27 : vector<8x128xf32>
    %c0_24 = arith.constant 0 : index
    %c0_25 = arith.constant 0 : index
    %29 = vector.load %arg10[%c0_24, %c0_25] : memref<8x128xf32, #tpu.memory_space<vmem>>, vector<8x128xf32>
    tpu.vector_store %arg10[%c0_24, %c0_25], %23 {strides = array<i32>} : memref<8x128xf32, #tpu.memory_space<vmem>>, vector<8x128xf32>,
    %c0_26 = arith.constant 0 : index
    %c0_27 = arith.constant 0 : index
    %30 = vector.load %arg11[%c0_26, %c0_27] : memref<8x128xf32, #tpu.memory_space<vmem>>, vector<8x128xf32>
    tpu.vector_store %arg11[%c0_26, %c0_27], %28 {strides = array<i32>} : memref<8x128xf32, #tpu.memory_space<vmem>>, vector<8x128xf32>,
    return
  }
  func.func @transform_0(%arg0: i32) -> (i32, i32) {
    %c0_i32 = arith.constant 0 : i32
    %c0_i32_0 = arith.constant 0 : i32
    return %arg0, %c0_i32 : i32, i32
  }
  func.func @transform_1(%arg0: i32) -> (i32, i32) {
    %c0_i32 = arith.constant 0 : i32
    %c0_i32_0 = arith.constant 0 : i32
    %c0_i32_1 = arith.constant 0 : i32
    return %c0_i32, %c0_i32_0 : i32, i32
  }
  func.func @transform_2(%arg0: i32) -> (i32, i32) {
    %c0_i32 = arith.constant 0 : i32
    %c0_i32_0 = arith.constant 0 : i32
    %c0_i32_1 = arith.constant 0 : i32
    return %c0_i32, %c0_i32_0 : i32, i32
  }
  func.func @transform_3(%arg0: i32) -> (i32, i32) {
    %c0_i32 = arith.constant 0 : i32
    %c0_i32_0 = arith.constant 0 : i32
    %c0_i32_1 = arith.constant 0 : i32
    return %c0_i32, %c0_i32_0 : i32, i32
  }
  func.func @transform_4(%arg0: i32) -> (i32, i32) {
    %c0_i32 = arith.constant 0 : i32
    %c0_i32_0 = arith.constant 0 : i32
    %c0_i32_1 = arith.constant 0 : i32
    return %c0_i32, %c0_i32_0 : i32, i32
  }
  func.func @transform_5(%arg0: i32) -> (i32, i32) {
    %c0_i32 = arith.constant 0 : i32
    %c0_i32_0 = arith.constant 0 : i32
    %c0_i32_1 = arith.constant 0 : i32
    return %c0_i32, %c0_i32_0 : i32, i32
  }
  func.func @transform_6(%arg0: i32) -> (i32, i32) {
    %c0_i32 = arith.constant 0 : i32
    %c0_i32_0 = arith.constant 0 : i32
    %c0_i32_1 = arith.constant 0 : i32
    return %c0_i32, %c0_i32_0 : i32, i32
  }
  func.func @transform_7(%arg0: i32) -> (i32, i32) {
    %c0_i32 = arith.constant 0 : i32
    %c0_i32_0 = arith.constant 0 : i32
    %c0_i32_1 = arith.constant 0 : i32
    return %c0_i32, %c0_i32_0 : i32, i32
  }
  func.func @transform_8(%arg0: i32) -> (i32, i32) {
    %c0_i32 = arith.constant 0 : i32
    %c0_i32_0 = arith.constant 0 : i32
    %c0_i32_1 = arith.constant 0 : i32
    return %c0_i32, %c0_i32_0 : i32, i32
  }
  func.func @transform_9(%arg0: i32) -> (i32, i32) {
    %c0_i32 = arith.constant 0 : i32
    %c0_i32_0 = arith.constant 0 : i32
    return %arg0, %c0_i32 : i32, i32
  }
  func.func @transform_10(%arg0: i32) -> (i32, i32) {
    %c0_i32 = arith.constant 0 : i32
    %c0_i32_0 = arith.constant 0 : i32
    return %arg0, %c0_i32 : i32, i32
  }
}

</mosaic_0001>

<bundles_post_ra>
// kernel: tpu_custom_call.1
= control target key start
LH: loop header
LB: loop body
LE: loop exit
PB: predicated region body
PF: predicated region fallthrough
CT: control target
= control target key end

     0   :  { %16 = vsyncpa [#allocation3], 0  ;;  %s580_s0 = inlined_call_operand.hbm [shape: f32[8,16], index: 0, kind: input, shape index: {}]   ;;  %s581_s1 = inlined_call_operand.hbm [shape: f32[16,128], index: 1, kind: input, shape index: {}]   ;;  %s582_s2 = inlined_call_operand.vmem [shape: f32[1,128], index: 2, kind: input, shape index: {}]   ;;  %s583_s3 = inlined_call_operand.hbm [shape: f32[16,128], index: 3, kind: input, shape index: {}]   ;;  %s584_s4 = inlined_call_operand.vmem [shape: f32[1,128], index: 4, kind: input, shape index: {}]   ;;  %s585_s5 = inlined_call_operand.hbm [shape: f32[128,128], index: 5, kind: input, shape index: {}]   ;;  %s586_s6 = inlined_call_operand.vmem [shape: f32[1,128], index: 6, kind: input, shape index: {}]   ;;  %s587_s7 = inlined_call_operand.hbm [shape: f32[128,128], index: 7, kind: input, shape index: {}]   ;;  %s588_s8 = inlined_call_operand.vmem [shape: f32[1,128], index: 8, kind: input, shape index: {}]   ;;  %s589_s9 = inlined_call_operand.hbm [shape: f32[8,128], index: 9, kind: output, shape index: {0}]   ;;  %s590_s10 = inlined_call_operand.hbm [shape: f32[8,128], index: 10, kind: output, shape index: {1}]  }
   0x1   :  { %17 = vsyncpa [#allocation6], 0 }
   0x2   :  { %18 = vsyncpa [#allocation9], 0 }
   0x3   :  { %19 = vsyncpa [#allocation4], 0  ;;  %s36_s15 = sshll.u32 %s581_s1, 4  ;;  %s37_s15 = int_to_ptr.hbm [resolvable:$true] %s36_s15 }
   0x4   :  { %20 = vsyncpa [#allocation13], 0  ;;  %s483_s16 = smov [#allocation5]   ;;  %s66_s20 = sshll.u32 %s585_s5, 4  ;;  %s67_s20 = int_to_ptr.hbm [resolvable:$true] %s66_s20 }
   0x5   :  { %s38_s17 = sshll.u32 %s483_s16, 4  ;;  %s484_s21 = smov 128   ;;  %s39_s17 = int_to_ptr.vmem [resolvable:$true] %s38_s17 }
   0x6   :  { %s485_s22 = smov 8   ;;  %s486_s23 = smov [#allocation8]  }
   0x7   :  { %44 = dma.hbm_to_vmem [thread:$0]  %s37_s15, 256, %s39_s17, [#allocation6], %s484_s21, %s484_s21, %s485_s22  }
   0x8   :  { %s68_s24 = sshll.u32 %s486_s23, 4  ;;  %s26_s27 = sshll.u32 %s580_s0, 4  ;;  %s69_s24 = int_to_ptr.vmem [resolvable:$true] %s68_s24  ;;  %s27_s27 = int_to_ptr.hbm [resolvable:$true] %s26_s27 }
   0x9   :  { %74 = dma.hbm_to_vmem [thread:$0]  %s67_s20, 2048, %s69_s24, [#allocation9], %s484_s21, %s484_s21, %s485_s22  }
   0xa   :  { %s51_s29 = sshll.u32 %s583_s3, 4  ;;  %s487_s30 = smov [#allocation2]   ;;  %s52_s29 = int_to_ptr.hbm [resolvable:$true] %s51_s29 }
   0xb   :  { %s28_s11 = sshll.u32 %s487_s30, 4  ;;  %s488_s5 = smov [#allocation7]   ;;  %s29_s11 = int_to_ptr.vmem [resolvable:$true] %s28_s11 }
   0xc   :  { %31 = dma.hbm_to_vmem [thread:$0]  %s27_s27, 128, %s29_s11, [#allocation3]  }
   0xd   :  { %s53_s12 = sshll.u32 %s488_s5, 4  ;;  %s81_s15 = sshll.u32 %s587_s7, 4  ;;  %s54_s12 = int_to_ptr.vmem [resolvable:$true] %s53_s12  ;;  %s82_s15 = int_to_ptr.hbm [resolvable:$true] %s81_s15 }
   0xe   :  { %59 = dma.hbm_to_vmem [thread:$0]  %s52_s29, 256, %s54_s12, [#allocation6], %s484_s21, %s484_s21, %s485_s22  }
   0xf   :  { %s489_s0 = smov [#allocation10]  }
  0x10   :  { %s83_s16 = sshll.u32 %s489_s0, 4  ;;  %s84_s16 = int_to_ptr.vmem [resolvable:$true] %s83_s16 }
  0x11   :  { %89 = dma.hbm_to_vmem [thread:$0]  %s82_s15, 2048, %s84_s16, [#allocation9], %s484_s21, %s484_s21, %s485_s22  }
  0x12   :  { %473 = dma.done.wait [#allocation3], 128  }
  0x13   :  { %474 = vsyncadd [#allocation3], 4294967168 }
  0x14   :  { %475 = dma.done.wait [#allocation6], 512  }
  0x15   :  { %476 = vsyncadd [#allocation6], 4294966784 }
  0x16   :  { %477 = dma.done.wait [#allocation9], 4096  }
  0x17   :  { %478 = vsyncadd [#allocation9], 4294963200  ;;  %v114_v0 = vld [vmem:[#allocation5 + $0x8] sm:$0xff]  ;;  %v117_v1 = vld [vmem:[#allocation7 + $0x8] sm:$0xff]  ;;  %vm122_vm0 = vcmask 130048   ;;  %s262_s25 = sshll.u32 %s589_s9, 4  ;;  %s263_s25 = int_to_ptr.hbm [resolvable:$true] %s262_s25 }
  0x18   :  { %v113_v2 = vld [vmem:[#allocation5] sm:$0xff]  ;;  %140 = vmatpush.msra.mxu0 %v114_v0  ;;  %164 = vmatpush.msra.mxu1 %v117_v1  ;;  %v116_v3 = vld [vmem:[#allocation7] sm:$0xff]  ;;  %v112_v4 = vld [vmem:[#allocation2] sm:$0xff]  ;;  %s491_s26 = smov [#allocation12]  }
  0x19   :  { %v186_v5 = vld [vmem:[#allocation8 + $0x78] sm:$0xff]  ;;  %v185_v7 = vld [vmem:[#allocation8 + $0x70] sm:$0xff]  ;;  %v184_v9 = vld [vmem:[#allocation8 + $0x68] sm:$0xff]  ;;  %s271_s27 = sshll.u32 %s491_s26, 4  ;;  %s272_s27 = int_to_ptr.vmem [resolvable:$true] %s271_s27 }
  0x1a   :  { %208 = vmatpush.msra.mxu2 %v186_v5  ;;  %v203_v6 = vld [vmem:[#allocation10 + $0x78] sm:$0xff]  ;;  %141 = vmatpush.msra.mxu0 %v113_v2  ;;  %v202_v8 = vld [vmem:[#allocation10 + $0x70] sm:$0xff]  ;;  %v201_v10 = vld [vmem:[#allocation10 + $0x68] sm:$0xff] }
  0x1b   :  { %165 = vmatpush.msra.mxu1 %v116_v3  ;;  %290 = vmatmul.msk.f32.vlgmr.msra.gmra.mxu0 %vm122_vm0, %v112_v4  ;;  %v183_v11 = vld [vmem:[#allocation8 + $0x60] sm:$0xff]  ;;  %v182_v13 = vld [vmem:[#allocation8 + $0x58] sm:$0xff]  ;;  %v181_v15 = vld [vmem:[#allocation8 + $0x50] sm:$0xff] }
  0x1c   :  { %291 = vmatmul.msk.f32.vlgmr.msra.gmra.mxu1 %vm122_vm0, %v112_v4  ;;  %232 = vmatpush.msra.mxu3 %v203_v6  ;;  %v200_v12 = vld [vmem:[#allocation10 + $0x60] sm:$0xff]  ;;  %v199_v14 = vld [vmem:[#allocation10 + $0x58] sm:$0xff]  ;;  %v198_v16 = vld [vmem:[#allocation10 + $0x50] sm:$0xff] }
  0x1d   :  { %209 = vmatpush.msra.mxu2 %v185_v7  ;;  %v180_v17 = vld [vmem:[#allocation8 + $0x48] sm:$0xff]  ;;  %v179_v19 = vld [vmem:[#allocation8 + $0x40] sm:$0xff]  ;;  %v178_v21 = vld [vmem:[#allocation8 + $0x38] sm:$0xff] }
  0x1e   :  { %233 = vmatpush.msra.mxu3 %v202_v8  ;;  %v197_v18 = vld [vmem:[#allocation10 + $0x48] sm:$0xff]  ;;  %v196_v20 = vld [vmem:[#allocation10 + $0x40] sm:$0xff]  ;;  %v195_v22 = vld [vmem:[#allocation10 + $0x38] sm:$0xff] }
  0x1f   :  { %210 = vmatpush.msra.mxu2 %v184_v9  ;;  %v177_v23 = vld [vmem:[#allocation8 + $0x30] sm:$0xff]  ;;  %v176_v25 = vld [vmem:[#allocation8 + $0x28] sm:$0xff]  ;;  %v175_v27 = vld [vmem:[#allocation8 + $0x20] sm:$0xff] }
  0x20   :  { %234 = vmatpush.msra.mxu3 %v201_v10  ;;  %v194_v24 = vld [vmem:[#allocation10 + $0x30] sm:$0xff]  ;;  %v193_v26 = vld [vmem:[#allocation10 + $0x28] sm:$0xff]  ;;  %v192_v28 = vld [vmem:[#allocation10 + $0x20] sm:$0xff] }
  0x21   :  { %211 = vmatpush.msra.mxu2 %v183_v11  ;;  %v174_v29 = vld [vmem:[#allocation8 + $0x18] sm:$0xff]  ;;  %v173_v31 = vld [vmem:[#allocation8 + $0x10] sm:$0xff]  ;;  %v172_v33 = vld [vmem:[#allocation8 + $0x8] sm:$0xff] }
  0x22   :  { %235 = vmatpush.msra.mxu3 %v200_v12  ;;  %v191_v30 = vld [vmem:[#allocation10 + $0x18] sm:$0xff]  ;;  %v190_v32 = vld [vmem:[#allocation10 + $0x10] sm:$0xff]  ;;  %v189_v34 = vld [vmem:[#allocation10 + $0x8] sm:$0xff] }
  0x23   :  { %212 = vmatpush.msra.mxu2 %v182_v13  ;;  %v171_v35 = vld [vmem:[#allocation8] sm:$0xff]  ;;  %v301_v37 = vld [vmem:[%s582_s2] ss:$0 sm:$0xff]  ;;  %s490_s2 = smov [#allocation11]  }
  0x24   :  { %236 = vmatpush.msra.mxu3 %v199_v14  ;;  %v188_v36 = vld [vmem:[#allocation10] sm:$0xff]  ;;  %v302_v38 = vld [vmem:[%s584_s4] ss:$0 sm:$0xff]  ;;  %s260_s4 = sshll.u32 %s490_s2, 4  ;;  %s261_s4 = int_to_ptr.vmem [resolvable:$true] %s260_s4 }
  0x25   :  { %213 = vmatpush.msra.mxu2 %v181_v15  ;;  %v303_v45 = vld [vmem:[%s586_s6] ss:$0 sm:$0xff]  ;;  %s273_s6 = sshll.u32 %s590_s10, 4  ;;  %s274_s6 = int_to_ptr.hbm [resolvable:$true] %s273_s6 }
  0x26   :  { %237 = vmatpush.msra.mxu3 %v198_v16  ;;  %v304_v46 = vld [vmem:[%s588_s8] ss:$0 sm:$0xff] }
  0x27   :  { %214 = vmatpush.msra.mxu2 %v180_v17 }
  0x28   :  { %238 = vmatpush.msra.mxu3 %v197_v18 }
  0x29   :  { %215 = vmatpush.msra.mxu2 %v179_v19 }
  0x2a   :  { %239 = vmatpush.msra.mxu3 %v196_v20 }
  0x2b   :  { %216 = vmatpush.msra.mxu2 %v178_v21 }
  0x2c   :  { %240 = vmatpush.msra.mxu3 %v195_v22 }
  0x2d   :  { %217 = vmatpush.msra.mxu2 %v177_v23 }
  0x2e   :  { %241 = vmatpush.msra.mxu3 %v194_v24 }
  0x2f   :  { %218 = vmatpush.msra.mxu2 %v176_v25 }
  0x30   :  { %242 = vmatpush.msra.mxu3 %v193_v26 }
  0x31   :  { %219 = vmatpush.msra.mxu2 %v175_v27 }
  0x32   :  { %243 = vmatpush.msra.mxu3 %v192_v28 }
  0x33   :  { %220 = vmatpush.msra.mxu2 %v174_v29 }
  0x34   :  { %244 = vmatpush.msra.mxu3 %v191_v30 }
  0x35   :  { %221 = vmatpush.msra.mxu2 %v173_v31 }
  0x36   :  { %245 = vmatpush.msra.mxu3 %v190_v32 }
  0x37   :  { %222 = vmatpush.msra.mxu2 %v172_v33 }
  0x38   :  { %246 = vmatpush.msra.mxu3 %v189_v34 }
  0x39   :  { %223 = vmatpush.msra.mxu2 %v171_v35 }
  0x3a   :  { %247 = vmatpush.msra.mxu3 %v188_v36 }
  0x98   :  { %v143_v39 = vpop.f32.mrf.mxu0 }
  0x99   :  { %v167_v40 = vpop.f32.mrf.mxu1  ;;  %v144_v41 = vadd.f32 %v301_v37, %v143_v39 }
  0x9a   :  { %v168_v42 = vadd.f32 %v302_v38, %v167_v40 }
  0x9b   :  { %v146_v43 = vmax.f32 %v144_v41, 0.0 }
  0x9c   :  { %v170_v44 = vmax.f32 %v168_v42, 0.0 }
  0x9d   :  { %224 = vmatmul.f32.vlgmr.msra.gmra.mxu2 %v146_v43 }
  0x9e   :  { %248 = vmatmul.f32.vlgmr.msra.gmra.mxu3 %v170_v44 }
 0x120   :  { %v225_v47 = vpop.f32.mrf.mxu2 }
 0x121   :  { %v249_v48 = vpop.f32.mrf.mxu3  ;;  %v226_v49 = vadd.f32 %v303_v45, %v225_v47 }
 0x122   :  { %v250_v50 = vadd.f32 %v304_v46, %v249_v48 }
 0x123   :  { %v228_v51 = vmax.f32 %v226_v49, 0.0 }
 0x124   :  { %v252_v52 = vmax.f32 %v250_v50, 0.0 }
 0x125   :  { %253 = vst [vmem:[#allocation11] sm:$0xff] %v228_v51 }
 0x126   :  { %254 = vst [vmem:[#allocation12] sm:$0xff] %v252_v52  ;;  %265 = dma.vmem_to_hbm [thread:$0]  %s261_s4, 128, %s263_s25, [#allocation4]  }
 0x127   :  { %276 = dma.vmem_to_hbm [thread:$0]  %s272_s27, 128, %s274_s6, [#allocation13]  }
 0x128   :  { %479 = dma.done.wait [#allocation4], 128  }
 0x129   :  { %480 = vsyncadd [#allocation4], 4294967168 }
 0x12a   :  { %481 = dma.done.wait [#allocation13], 128  }
 0x12b   :  { %482 = vsyncadd [#allocation13], 4294967168 }
 0x12c   :  { %285 = vsyncpa [#allocation3], 1 }
 0x12d   :  { %286 = vsyncpa [#allocation6], 1 }
 0x12e   :  { %287 = vsyncpa [#allocation9], 1 }
 0x12f   :  { %288 = vsyncpa [#allocation4], 1 }
 0x130   :  { %289 = vsyncpa [#allocation13], 1 }

// kernel: tpu_custom_call.1
= control target key start
LH: loop header
LB: loop body
LE: loop exit
PB: predicated region body
PF: predicated region fallthrough
CT: control target
= control target key end

     0   :  { %16 = vsyncpa [#allocation3], 0  ;;  %s580_s0 = inlined_call_operand.hbm [shape: f32[8,16], index: 0, kind: input, shape index: {}]   ;;  %s581_s1 = inlined_call_operand.hbm [shape: f32[16,128], index: 1, kind: input, shape index: {}]   ;;  %s582_s2 = inlined_call_operand.vmem [shape: f32[1,128], index: 2, kind: input, shape index: {}]   ;;  %s583_s3 = inlined_call_operand.hbm [shape: f32[16,128], index: 3, kind: input, shape index: {}]   ;;  %s584_s4 = inlined_call_operand.vmem [shape: f32[1,128], index: 4, kind: input, shape index: {}]   ;;  %s585_s5 = inlined_call_operand.hbm [shape: f32[128,128], index: 5, kind: input, shape index: {}]   ;;  %s586_s6 = inlined_call_operand.vmem [shape: f32[1,128], index: 6, kind: input, shape index: {}]   ;;  %s587_s7 = inlined_call_operand.hbm [shape: f32[128,128], index: 7, kind: input, shape index: {}]   ;;  %s588_s8 = inlined_call_operand.vmem [shape: f32[1,128], index: 8, kind: input, shape index: {}]   ;;  %s589_s9 = inlined_call_operand.hbm [shape: f32[8,128], index: 9, kind: output, shape index: {0}]   ;;  %s590_s10 = inlined_call_operand.hbm [shape: f32[8,128], index: 10, kind: output, shape index: {1}]  }
   0x1   :  { %17 = vsyncpa [#allocation6], 0 }
   0x2   :  { %18 = vsyncpa [#allocation9], 0 }
   0x3   :  { %19 = vsyncpa [#allocation4], 0  ;;  %s36_s15 = sshll.u32 %s581_s1, 4  ;;  %s37_s15 = int_to_ptr.hbm [resolvable:$true] %s36_s15 }
   0x4   :  { %20 = vsyncpa [#allocation13], 0  ;;  %s483_s16 = smov [#allocation5]   ;;  %s66_s20 = sshll.u32 %s585_s5, 4  ;;  %s67_s20 = int_to_ptr.hbm [resolvable:$true] %s66_s20 }
   0x5   :  { %s38_s17 = sshll.u32 %s483_s16, 4  ;;  %s484_s21 = smov 128   ;;  %s39_s17 = int_to_ptr.vmem [resolvable:$true] %s38_s17 }
   0x6   :  { %s485_s22 = smov 8   ;;  %s486_s23 = smov [#allocation8]  }
   0x7   :  { %44 = dma.hbm_to_vmem [thread:$0]  %s37_s15, 256, %s39_s17, [#allocation6], %s484_s21, %s484_s21, %s485_s22  }
   0x8   :  { %s68_s24 = sshll.u32 %s486_s23, 4  ;;  %s26_s27 = sshll.u32 %s580_s0, 4  ;;  %s69_s24 = int_to_ptr.vmem [resolvable:$true] %s68_s24  ;;  %s27_s27 = int_to_ptr.hbm [resolvable:$true] %s26_s27 }
   0x9   :  { %74 = dma.hbm_to_vmem [thread:$0]  %s67_s20, 2048, %s69_s24, [#allocation9], %s484_s21, %s484_s21, %s485_s22  }
   0xa   :  { %s51_s29 = sshll.u32 %s583_s3, 4  ;;  %s487_s30 = smov [#allocation2]   ;;  %s52_s29 = int_to_ptr.hbm [resolvable:$true] %s51_s29 }
   0xb   :  { %s28_s11 = sshll.u32 %s487_s30, 4  ;;  %s488_s5 = smov [#allocation7]   ;;  %s29_s11 = int_to_ptr.vmem [resolvable:$true] %s28_s11 }
   0xc   :  { %31 = dma.hbm_to_vmem [thread:$0]  %s27_s27, 128, %s29_s11, [#allocation3]  }
   0xd   :  { %s53_s12 = sshll.u32 %s488_s5, 4  ;;  %s81_s15 = sshll.u32 %s587_s7, 4  ;;  %s54_s12 = int_to_ptr.vmem [resolvable:$true] %s53_s12  ;;  %s82_s15 = int_to_ptr.hbm [resolvable:$true] %s81_s15 }
   0xe   :  { %59 = dma.hbm_to_vmem [thread:$0]  %s52_s29, 256, %s54_s12, [#allocation6], %s484_s21, %s484_s21, %s485_s22  }
   0xf   :  { %s489_s0 = smov [#allocation10]  }
  0x10   :  { %s83_s16 = sshll.u32 %s489_s0, 4  ;;  %s84_s16 = int_to_ptr.vmem [resolvable:$true] %s83_s16 }
  0x11   :  { %89 = dma.hbm_to_vmem [thread:$0]  %s82_s15, 2048, %s84_s16, [#allocation9], %s484_s21, %s484_s21, %s485_s22  }
  0x12   :  { %473 = dma.done.wait [#allocation3], 128  }
  0x13   :  { %474 = vsyncadd [#allocation3], 4294967168 }
  0x14   :  { %475 = dma.done.wait [#allocation6], 512  }
  0x15   :  { %476 = vsyncadd [#allocation6], 4294966784 }
  0x16   :  { %477 = dma.done.wait [#allocation9], 4096  }
  0x17   :  { %478 = vsyncadd [#allocation9], 4294963200  ;;  %v114_v0 = vld [vmem:[#allocation5 + $0x8] sm:$0xff]  ;;  %v117_v1 = vld [vmem:[#allocation7 + $0x8] sm:$0xff]  ;;  %vm122_vm0 = vcmask 130048   ;;  %s262_s25 = sshll.u32 %s589_s9, 4  ;;  %s263_s25 = int_to_ptr.hbm [resolvable:$true] %s262_s25 }
  0x18   :  { %v113_v2 = vld [vmem:[#allocation5] sm:$0xff]  ;;  %140 = vmatpush.msra.mxu0 %v114_v0  ;;  %164 = vmatpush.msra.mxu1 %v117_v1  ;;  %v116_v3 = vld [vmem:[#allocation7] sm:$0xff]  ;;  %v112_v4 = vld [vmem:[#allocation2] sm:$0xff]  ;;  %s491_s26 = smov [#allocation12]  }
  0x19   :  { %v186_v5 = vld [vmem:[#allocation8 + $0x78] sm:$0xff]  ;;  %v185_v7 = vld [vmem:[#allocation8 + $0x70] sm:$0xff]  ;;  %v184_v9 = vld [vmem:[#allocation8 + $0x68] sm:$0xff]  ;;  %s271_s27 = sshll.u32 %s491_s26, 4  ;;  %s272_s27 = int_to_ptr.vmem [resolvable:$true] %s271_s27 }
  0x1a   :  { %208 = vmatpush.msra.mxu2 %v186_v5  ;;  %v203_v6 = vld [vmem:[#allocation10 + $0x78] sm:$0xff]  ;;  %141 = vmatpush.msra.mxu0 %v113_v2  ;;  %v202_v8 = vld [vmem:[#allocation10 + $0x70] sm:$0xff]  ;;  %v201_v10 = vld [vmem:[#allocation10 + $0x68] sm:$0xff] }
  0x1b   :  { %165 = vmatpush.msra.mxu1 %v116_v3  ;;  %290 = vmatmul.msk.f32.vlgmr.msra.gmra.mxu0 %vm122_vm0, %v112_v4  ;;  %v183_v11 = vld [vmem:[#allocation8 + $0x60] sm:$0xff]  ;;  %v182_v13 = vld [vmem:[#allocation8 + $0x58] sm:$0xff]  ;;  %v181_v15 = vld [vmem:[#allocation8 + $0x50] sm:$0xff] }
  0x1c   :  { %291 = vmatmul.msk.f32.vlgmr.msra.gmra.mxu1 %vm122_vm0, %v112_v4  ;;  %232 = vmatpush.msra.mxu3 %v203_v6  ;;  %v200_v12 = vld [vmem:[#allocation10 + $0x60] sm:$0xff]  ;;  %v199_v14 = vld [vmem:[#allocation10 + $0x58] sm:$0xff]  ;;  %v198_v16 = vld [vmem:[#allocation10 + $0x50] sm:$0xff] }
  0x1d   :  { %209 = vmatpush.msra.mxu2 %v185_v7  ;;  %v180_v17 = vld [vmem:[#allocation8 + $0x48] sm:$0xff]  ;;  %v179_v19 = vld [vmem:[#allocation8 + $0x40] sm:$0xff]  ;;  %v178_v21 = vld [vmem:[#allocation8 + $0x38] sm:$0xff] }
  0x1e   :  { %233 = vmatpush.msra.mxu3 %v202_v8  ;;  %v197_v18 = vld [vmem:[#allocation10 + $0x48] sm:$0xff]  ;;  %v196_v20 = vld [vmem:[#allocation10 + $0x40] sm:$0xff]  ;;  %v195_v22 = vld [vmem:[#allocation10 + $0x38] sm:$0xff] }
  0x1f   :  { %210 = vmatpush.msra.mxu2 %v184_v9  ;;  %v177_v23 = vld [vmem:[#allocation8 + $0x30] sm:$0xff]  ;;  %v176_v25 = vld [vmem:[#allocation8 + $0x28] sm:$0xff]  ;;  %v175_v27 = vld [vmem:[#allocation8 + $0x20] sm:$0xff] }
  0x20   :  { %234 = vmatpush.msra.mxu3 %v201_v10  ;;  %v194_v24 = vld [vmem:[#allocation10 + $0x30] sm:$0xff]  ;;  %v193_v26 = vld [vmem:[#allocation10 + $0x28] sm:$0xff]  ;;  %v192_v28 = vld [vmem:[#allocation10 + $0x20] sm:$0xff] }
  0x21   :  { %211 = vmatpush.msra.mxu2 %v183_v11  ;;  %v174_v29 = vld [vmem:[#allocation8 + $0x18] sm:$0xff]  ;;  %v173_v31 = vld [vmem:[#allocation8 + $0x10] sm:$0xff]  ;;  %v172_v33 = vld [vmem:[#allocation8 + $0x8] sm:$0xff] }
  0x22   :  { %235 = vmatpush.msra.mxu3 %v200_v12  ;;  %v191_v30 = vld [vmem:[#allocation10 + $0x18] sm:$0xff]  ;;  %v190_v32 = vld [vmem:[#allocation10 + $0x10] sm:$0xff]  ;;  %v189_v34 = vld [vmem:[#allocation10 + $0x8] sm:$0xff] }
  0x23   :  { %212 = vmatpush.msra.mxu2 %v182_v13  ;;  %v171_v35 = vld [vmem:[#allocation8] sm:$0xff]  ;;  %v301_v37 = vld [vmem:[%s582_s2] ss:$0 sm:$0xff]  ;;  %s490_s2 = smov [#allocation11]  }
  0x24   :  { %236 = vmatpush.msra.mxu3 %v199_v14  ;;  %v188_v36 = vld [vmem:[#allocation10] sm:$0xff]  ;;  %v302_v38 = vld [vmem:[%s584_s4] ss:$0 sm:$0xff]  ;;  %s260_s4 = sshll.u32 %s490_s2, 4  ;;  %s261_s4 = int_to_ptr.vmem [resolvable:$true] %s260_s4 }
  0x25   :  { %213 = vmatpush.msra.mxu2 %v181_v15  ;;  %v303_v45 = vld [vmem:[%s586_s6] ss:$0 sm:$0xff]  ;;  %s273_s6 = sshll.u32 %s590_s10, 4  ;;  %s274_s6 = int_to_ptr.hbm [resolvable:$true] %s273_s6 }
  0x26   :  { %237 = vmatpush.msra.mxu3 %v198_v16  ;;  %v304_v46 = vld [vmem:[%s588_s8] ss:$0 sm:$0xff] }
  0x27   :  { %214 = vmatpush.msra.mxu2 %v180_v17 }
  0x28   :  { %238 = vmatpush.msra.mxu3 %v197_v18 }
  0x29   :  { %215 = vmatpush.msra.mxu2 %v179_v19 }
  0x2a   :  { %239 = vmatpush.msra.mxu3 %v196_v20 }
  0x2b   :  { %216 = vmatpush.msra.mxu2 %v178_v21 }
  0x2c   :  { %240 = vmatpush.msra.mxu3 %v195_v22 }
  0x2d   :  { %217 = vmatpush.msra.mxu2 %v177_v23 }
  0x2e   :  { %241 = vmatpush.msra.mxu3 %v194_v24 }
  0x2f   :  { %218 = vmatpush.msra.mxu2 %v176_v25 }
  0x30   :  { %242 = vmatpush.msra.mxu3 %v193_v26 }
  0x31   :  { %219 = vmatpush.msra.mxu2 %v175_v27 }
  0x32   :  { %243 = vmatpush.msra.mxu3 %v192_v28 }
  0x33   :  { %220 = vmatpush.msra.mxu2 %v174_v29 }
  0x34   :  { %244 = vmatpush.msra.mxu3 %v191_v30 }
  0x35   :  { %221 = vmatpush.msra.mxu2 %v173_v31 }
  0x36   :  { %245 = vmatpush.msra.mxu3 %v190_v32 }
  0x37   :  { %222 = vmatpush.msra.mxu2 %v172_v33 }
  0x38   :  { %246 = vmatpush.msra.mxu3 %v189_v34 }
  0x39   :  { %223 = vmatpush.msra.mxu2 %v171_v35 }
  0x3a   :  { %247 = vmatpush.msra.mxu3 %v188_v36 }
  0x98   :  { %v143_v39 = vpop.f32.mrf.mxu0 }
  0x99   :  { %v167_v40 = vpop.f32.mrf.mxu1  ;;  %v144_v41 = vadd.f32 %v301_v37, %v143_v39 }
  0x9a   :  { %v168_v42 = vadd.f32 %v302_v38, %v167_v40 }
  0x9b   :  { %v146_v43 = vmax.f32 %v144_v41, 0.0 }
  0x9c   :  { %v170_v44 = vmax.f32 %v168_v42, 0.0 }
  0x9d   :  { %224 = vmatmul.f32.vlgmr.msra.gmra.mxu2 %v146_v43 }
  0x9e   :  { %248 = vmatmul.f32.vlgmr.msra.gmra.mxu3 %v170_v44 }
 0x120   :  { %v225_v47 = vpop.f32.mrf.mxu2 }
 0x121   :  { %v249_v48 = vpop.f32.mrf.mxu3  ;;  %v226_v49 = vadd.f32 %v303_v45, %v225_v47 }
 0x122   :  { %v250_v50 = vadd.f32 %v304_v46, %v249_v48 }
 0x123   :  { %v228_v51 = vmax.f32 %v226_v49, 0.0 }
 0x124   :  { %v252_v52 = vmax.f32 %v250_v50, 0.0 }
 0x125   :  { %253 = vst [vmem:[#allocation11] sm:$0xff] %v228_v51 }
 0x126   :  { %254 = vst [vmem:[#allocation12] sm:$0xff] %v252_v52  ;;  %265 = dma.vmem_to_hbm [thread:$0]  %s261_s4, 128, %s263_s25, [#allocation4]  }
 0x127   :  { %276 = dma.vmem_to_hbm [thread:$0]  %s272_s27, 128, %s274_s6, [#allocation13]  }
 0x128   :  { %479 = dma.done.wait [#allocation4], 128  }
 0x129   :  { %480 = vsyncadd [#allocation4], 4294967168 }
 0x12a   :  { %481 = dma.done.wait [#allocation13], 128  }
 0x12b   :  { %482 = vsyncadd [#allocation13], 4294967168 }
 0x12c   :  { %285 = vsyncpa [#allocation3], 1 }
 0x12d   :  { %286 = vsyncpa [#allocation6], 1 }
 0x12e   :  { %287 = vsyncpa [#allocation9], 1 }
 0x12f   :  { %288 = vsyncpa [#allocation4], 1 }
 0x130   :  { %289 = vsyncpa [#allocation13], 1 }

</bundles_post_ra>
